<compile_context>
chip_gen: v7x
topology: tpu7x:2x2x1
jax: 0.10.0
libtpu: 0.0.40
codegen_flags: <defaults>
</compile_context>

<pallas_src>
import functools

import jax
import jax.numpy as jnp
from jax.experimental import pallas as pl
from jax.experimental.pallas import tpu as pltpu


def _prop_kernel(x_ref, w_ref, b_ref, o_ref):
    # x_ref: [tm, D] (native dtype)  w_ref: [D, O] (bf16)  b_ref: [1, O] (f32)
    # In-kernel bf16 cast: rides the VPU while the pipeline streams x once at
    # its native width (no separate wrapper-side cast pass over HBM).
    x = x_ref[...].astype(jnp.bfloat16)
    y = jnp.dot(x, w_ref[...], preferred_element_type=jnp.float32)
    y = y + b_ref[...]                      # broadcast [1, O] over rows (f32)
    o_ref[...] = jnp.maximum(y, 0.0).astype(o_ref.dtype)


def _prop_res_kernel(x_ref, w_ref, b_ref, r_ref, o_ref):
    # Residual variant: relu(linear(x) + res), matching the PyTorch module.
    x = x_ref[...].astype(jnp.bfloat16)
    y = jnp.dot(x, w_ref[...], preferred_element_type=jnp.float32)
    y = y + b_ref[...] + r_ref[...].astype(jnp.float32)
    o_ref[...] = jnp.maximum(y, 0.0).astype(o_ref.dtype)


def _round_up(x, m):
    return ((x + m - 1) // m) * m


def prepare_params(w, b):
    """One-time parameter prep (call once at init, outside the jit hot path):
    weight -> bf16 [D, O] (transposed vs. torch Linear.weight), bias -> f32 [1, O]."""
    return w.astype(jnp.bfloat16), b.reshape(1, -1).astype(jnp.float32)


@functools.partial(jax.jit, static_argnames=("tm", "out_dtype"))
def propagator(x, w, b, res=None, *, tm=512, out_dtype=None):
    """x: [B, N, D] -> relu(x @ w + b [+ res]): [B, N, O].

    w: [D, O] (transposed vs. torch.nn.Linear.weight, ideally pre-cast to bf16
    via prepare_params), b: [O] or [1, O], res: optional [B, N, O] residual
    added before the ReLU.  out_dtype: output dtype (default: x.dtype).
    """
    B, N, D = x.shape
    O = w.shape[-1]
    M = B * N

    # Free reshapes; dtype fixes are no-ops when prepare_params() was used.
    x2 = x.reshape(M, D)
    wb = w.astype(jnp.bfloat16)
    b2 = b.reshape(1, O).astype(jnp.float32)

    if out_dtype is None:
        out_dtype = x.dtype

    # Row tile: >=512 hits ~85% of the HBM roofline, multiple of 16 for bf16
    # sublane packing, and capped so the row grid has >= 2 "parallel" steps
    # when there is enough work (lets v7x shard across its 2 TensorCores).
    tm_eff = min(tm, _round_up(M, 16))
    if M >= 512:
        tm_eff = min(tm_eff, _round_up(-(-M // 2), 16))
    grid = (pl.cdiv(M, tm_eff),)   # partial last block handled by Pallas masking

    x_spec = pl.BlockSpec((tm_eff, D), lambda i: (i, 0))
    o_spec = pl.BlockSpec((tm_eff, O), lambda i: (i, 0))
    # Grid-invariant index_maps -> weight/bias stay resident in VMEM across
    # all row tiles (never re-fetched).
    # TODO(synk): on v7x (64 MiB VMEM) single-buffer these resident blocks and,
    # for very large D*O, add a K/N grid axis with an f32 VMEM accumulator.
    w_spec = pl.BlockSpec((D, O), lambda i: (0, 0))
    b_spec = pl.BlockSpec((1, O), lambda i: (0, 0))

    bytes_accessed = (x2.size * x2.dtype.itemsize
                      + wb.size * wb.dtype.itemsize
                      + b2.size * b2.dtype.itemsize
                      + M * O * jnp.dtype(out_dtype).itemsize)

    if res is None:
        kernel = _prop_kernel
        in_specs = [x_spec, w_spec, b_spec]
        args = (x2, wb, b2)
    else:
        r2 = res.reshape(M, O)               # native dtype; cast inside kernel
        bytes_accessed += r2.size * r2.dtype.itemsize
        kernel = _prop_res_kernel
        in_specs = [x_spec, w_spec, b_spec,
                    pl.BlockSpec((tm_eff, O), lambda i: (i, 0))]
        args = (x2, wb, b2, r2)
        # TODO(synk): alias res -> output (input_output_aliases={3: 0}) only
        # when the caller donates `res`; without donation XLA inserts a
        # defensive copy that costs an extra HBM pass, so it is skipped here.

    out = pl.pallas_call(
        kernel,
        out_shape=jax.ShapeDtypeStruct((M, O), out_dtype),
        grid_spec=pltpu.PrefetchScalarGridSpec(
            num_scalar_prefetch=0,
            grid=grid,
            in_specs=in_specs,
            out_specs=o_spec,
        ),
        compiler_params=pltpu.CompilerParams(
            dimension_semantics=("parallel",)),
        cost_estimate=pl.CostEstimate(
            flops=int(2 * M * D * O),
            transcendentals=0,
            bytes_accessed=int(bytes_accessed)),
    )(*args)

    return out.reshape(B, N, O)


def _init_linear(key, fan_in, fan_out, dtype=jnp.float32):
    """PyTorch nn.Linear-style init; weight returned transposed to [fan_in, fan_out]."""
    k_w, k_b = jax.random.split(key)
    bound = 1.0 / (fan_in ** 0.5)
    w = jax.random.uniform(k_w, (fan_in, fan_out), dtype, minval=-bound, maxval=bound)
    b = jax.random.uniform(k_b, (fan_out,), dtype, minval=-bound, maxval=bound)
    return w, b


def _reference(x, w, b, res=None):
    """Pure-JAX reference with the same bf16-matmul / f32-accumulate math."""
    B, N, D = x.shape
    O = w.shape[-1]
    x2 = x.reshape(B * N, D)
    y = jnp.dot(x2.astype(jnp.bfloat16), w.astype(jnp.bfloat16),
                preferred_element_type=jnp.float32) + b.reshape(1, O)
    if res is not None:
        y = y + res.reshape(B * N, O)
    return jnp.maximum(y, 0.0).reshape(B, N, O)


if __name__ == "__main__":
    key = jax.random.PRNGKey(0)
    k_x, k_lin, k_res, k_x2 = jax.random.split(key, 4)

    # Shapes consistent with Propagator.forward: x is [B, n_particles/relations, D].
    B, N = 2, 512
    input_size, output_size = 64, 128   # O=128 -> lane-dense output stores

    x = jax.random.normal(k_x, (B, N, input_size), jnp.float32)
    w_f32, b_f32 = _init_linear(k_lin, input_size, output_size)
    w, b = prepare_params(w_f32, b_f32)   # one-time cast, hoisted off the call path
    res = jax.random.normal(k_res, (B, N, output_size), jnp.float32)

    # 1) residual=False path (2 parallel grid steps).
    y = propagator(x, w, b)
    jax.block_until_ready(y)
    ref = _reference(x, w_f32, b_f32)
    assert y.shape == (B, N, output_size)
    assert y.dtype == x.dtype
    assert jnp.allclose(y, ref, atol=2e-3, rtol=2e-3)

    # 2) residual=True path: relu(linear(x) + res).
    y_res = propagator(x, w, b, res)
    jax.block_until_ready(y_res)
    ref_res = _reference(x, w_f32, b_f32, res)
    assert jnp.allclose(y_res, ref_res, atol=2e-3, rtol=2e-3)

    # 3) Non-multiple M (exercises the masked partial last block, no padding).
    N3 = 300
    x3 = jax.random.normal(k_x2, (B, N3, input_size), jnp.float32)
    y3 = propagator(x3, w, b)
    jax.block_until_ready(y3)
    ref3 = _reference(x3, w_f32, b_f32)
    assert y3.shape == (B, N3, output_size)
    assert jnp.allclose(y3, ref3, atol=2e-3, rtol=2e-3)

    # 4) bf16 output path (halves the largest HBM stream when tolerated).
    y_bf16 = propagator(x, w, b, out_dtype=jnp.bfloat16)
    jax.block_until_ready(y_bf16)
    assert y_bf16.dtype == jnp.bfloat16
    assert jnp.allclose(y_bf16.astype(jnp.float32), ref, atol=3e-2, rtol=3e-2)

    print("KERNEL_OK")
</pallas_src>

<mosaic_0001>
module attributes {stable_mosaic.version = 11 : i64} {
  func.func @_prop_kernel(%arg0: i32, %arg1: memref<512x64xf32, #tpu.memory_space<vmem>>, %arg2: memref<64x128xbf16, #tpu.memory_space<vmem>>, %arg3: memref<1x128xf32, #tpu.memory_space<vmem>>, %arg4: memref<512x128xf32, #tpu.memory_space<vmem>>) attributes {dimension_semantics = [#tpu.dimension_semantics<parallel>], iteration_bounds = array<i64: 2>, scalar_prefetch = 0 : i64, scratch_operands = 0 : i64, tpu.core_type = #tpu.core_type<tc>, window_params = [{transform_indices = @transform_0, window_bounds = array<i64: 512, 64>}, {pipeline_mode = #tpu.pipeline_mode<synchronous>, transform_indices = @transform_1, window_bounds = array<i64: 64, 128>}, {pipeline_mode = #tpu.pipeline_mode<synchronous>, transform_indices = @transform_2, window_bounds = array<i64: 1, 128>}, {transform_indices = @transform_3, window_bounds = array<i64: 512, 128>}]} {
    %c0 = arith.constant 0 : index
    %c0_0 = arith.constant 0 : index
    %0 = vector.load %arg1[%c0, %c0_0] : memref<512x64xf32, #tpu.memory_space<vmem>>, vector<512x64xf32>
    %1 = arith.truncf %0 : vector<512x64xf32> to vector<512x64xbf16>
    %c0_1 = arith.constant 0 : index
    %c0_2 = arith.constant 0 : index
    %2 = vector.load %arg2[%c0_1, %c0_2] : memref<64x128xbf16, #tpu.memory_space<vmem>>, vector<64x128xbf16>
    %cst = arith.constant dense<0.000000e+00> : vector<512x128xf32>
    %3 = tpu.matmul %1, %2, %cst {dimension_numbers = #tpu.dot_dimension_numbers<[1], [0], [0], [1], [0, 0, 1, 1], [], []>} : vector<512x64xbf16>, vector<64x128xbf16>, vector<512x128xf32> -> vector<512x128xf32>
    %c0_3 = arith.constant 0 : index
    %c0_4 = arith.constant 0 : index
    %4 = vector.load %arg3[%c0_3, %c0_4] : memref<1x128xf32, #tpu.memory_space<vmem>>, vector<1x128xf32>
    %5 = vector.broadcast %4 : vector<1x128xf32> to vector<512x128xf32>
    %6 = arith.addf %3, %5 : vector<512x128xf32>
    %cst_5 = arith.constant 0.000000e+00 : f32
    %7 = vector.broadcast %cst_5 : f32 to vector<512x128xf32>
    %8 = arith.maximumf %6, %7 : vector<512x128xf32>
    %c0_6 = arith.constant 0 : index
    %c0_7 = arith.constant 0 : index
    %9 = vector.load %arg4[%c0_6, %c0_7] : memref<512x128xf32, #tpu.memory_space<vmem>>, vector<512x128xf32>
    tpu.vector_store %arg4[%c0_6, %c0_7], %8 {strides = array<i32>} : memref<512x128xf32, #tpu.memory_space<vmem>>, vector<512x128xf32>,
    return
  }
  func.func @transform_0(%arg0: i32) -> (i32, i32) {
    %c0_i32 = arith.constant 0 : i32
    %c0_i32_0 = arith.constant 0 : i32
    return %arg0, %c0_i32 : i32, i32
  }
  func.func @transform_1(%arg0: i32) -> (i32, i32) {
    %c0_i32 = arith.constant 0 : i32
    %c0_i32_0 = arith.constant 0 : i32
    %c0_i32_1 = arith.constant 0 : i32
    return %c0_i32, %c0_i32_0 : i32, i32
  }
  func.func @transform_2(%arg0: i32) -> (i32, i32) {
    %c0_i32 = arith.constant 0 : i32
    %c0_i32_0 = arith.constant 0 : i32
    %c0_i32_1 = arith.constant 0 : i32
    return %c0_i32, %c0_i32_0 : i32, i32
  }
  func.func @transform_3(%arg0: i32) -> (i32, i32) {
    %c0_i32 = arith.constant 0 : i32
    %c0_i32_0 = arith.constant 0 : i32
    return %arg0, %c0_i32 : i32, i32
  }
}

</mosaic_0001>

<bundles_post_ra>
// kernel: propagator.1
= control target key start
LH: loop header
LB: loop body
LE: loop exit
PB: predicated region body
PF: predicated region fallthrough
CT: control target
= control target key end

     0   :  { %8 = vsyncpa [#allocation3], 0  ;;  %s1548_s0 = inlined_call_operand.vmem [shape: f32[1024,64], index: 0, kind: input, shape index: {}]   ;;  %s1549_s1 = inlined_call_operand.vmem [shape: bf16[64,128], index: 1, kind: input, shape index: {}]   ;;  %s1550_s2 = inlined_call_operand.vmem [shape: f32[1,128], index: 2, kind: input, shape index: {}]   ;;  %s1551_s3 = inlined_call_operand.hbm [shape: f32[1024,128], index: 3, kind: output, shape index: {}]  }
   0x1   :  { %10 = vsyncpa [#allocation3 + $0x1], 0  ;;  %s1196_s12 = smov 0   ;;  %s1198_s13 = smov 0  }
   0x2   :  { %s1200_s14 = smov 0   ;;  %s1202_s15 = smov 0  }
   0x3 LB: > { %s1217_s16 = sadd.s32 4294967295, %s1171_s15   ;;  %s898_s17 = sadd.s32 4294967294, %s1171_s15   ;;  %s1171_s15 = sphi %s1202_s15, %s1557_s15   ;;  %s1167_s14 = sphi %s1200_s14, %s1556_s14   ;;  %s1163_s13 = sphi %s1198_s13, %s1555_s13   ;;  %s1159_s12 = sphi %s1196_s12, %s1554_s12  }
   0x4   : > { %s1221_s18 = sadd.s32 1, %s1171_s15   ;;  %s91_s19 = sadd.s32 1, %s1167_s14 }
   0x5   : > { %s88_s20 = ssub.s32 %s1171_s15, %s1221_s18  ;;  %p101_p0 = scmp.ne.s32.totalorder %s1167_s14, %s1163_s13 }
   0x6   : > { %p89_p1 = scmp.eq.s32.totalorder %s88_s20, 0  ;;  %p102_p2 = scmp.eq.s32.totalorder %s1217_s16, 1 }
   0x7   : > { %p107_p3 = scmp.ne.s32.totalorder %s1163_s13, %s1159_s12  ;;  %p108_p4 = scmp.eq.s32.totalorder %s898_s17, 1 }
   0x8   : > { %s1232_s21 = scalar_select %p89_p1, %s1167_s14, %s91_s19  }
   0x9   : > { %p1234_p5 = por %p102_p2, %p101_p0  ;;  %p1238_p6 = por %p108_p4, %p107_p3 }
   0xa   : > { %p901_p7 = scmp.ge.s32.totalorder %s1171_s15, 1  ;;  %p141_p8 = scmp.lt.s32.totalorder %s1171_s15, 3 }
   0xc   : > { %p142_p9 = pnand %p901_p7, %p141_p8 }
   0xd   : > { %v1105_v0 = vld [vmem:[%s1549_s1] sm:$0xff] (!%p142_p9)   ;;  %s903_s26 = sshll.u32 (!%p142_p9), %s1217_s16, 6  ;;  %v1106_v1 = vld [vmem:[%s1549_s1 + $0x8] sm:$0xff] (!%p142_p9)   ;;  %v1107_v2 = vld [vmem:[%s1549_s1 + $0x10] sm:$0xff] (!%p142_p9)   ;;  %vm308_vm0 = vcmask (!%p142_p9), 523264   ;;  %s162_s10 = sand.u32 (!%p142_p9), 1, %s1163_s13  }
   0xe   : > { %145 = sbr.rel (%p142_p9) target bundleno = 321 (0x141), region = 32  ;;  %p166_p10 = scmp.lt.s32.totalorder (!%p142_p9), %s903_s26, 127  ;;  %984 = vmatprep.subr.bf16.mxu0 (!%p142_p9), %v1105_v0  ;;  %1056 = vmatprep.subr.bf16.mxu1 (!%p142_p9), %v1105_v0  ;;  %v1108_v6 = vld [vmem:[%s1549_s1 + $0x18] sm:$0xff] (!%p142_p9)  }
   0xf   : > { %985 = vmatpush3.bf16.msra.mxu0 (!%p142_p9), %v1105_v0  ;;  %1060 = vmatpush3.bf16.msra.mxu1 (!%p142_p9), %v1105_v0  ;;  %s902_s19 = sshll.u32 (!%p142_p9), %s162_s10, 9  ;;  %s947_s24 = sshll.u32 (!%p142_p9), %s1217_s16, 13 }
  0x10   : > { %986 = vmatprep.subr.bf16.mxu0 (!%p142_p9), %v1106_v1  ;;  %1057 = vmatprep.subr.bf16.mxu1 (!%p142_p9), %v1106_v1  ;;  %s1374_s20 = scalar_lea.vmem (!%p142_p9), [#allocation2], %s902_s19  ;;  %s1495_s27 = scalar_lea.hbm (!%p142_p9), %s1551_s3, %s947_s24 }
  0x11   : > { %s836_s25 = sshll.u32 (!%p142_p9), %s1374_s20, 4  ;;  %s1507_s28 = scalar_lea.sflag (!%p142_p9), [#allocation3], %s162_s10  ;;  %s1497_s25 = int_to_ptr.vmem [resolvable:$true] %s836_s25 }
  0x12   : > { %s1109_s29 = scalar_lea.vmem (!%p142_p9), %s1497_s25, 8192  ;;  %s1173_s30 = smov (!%p142_p9), [#allocation2]  }
  0x13   : > { %987 = vmatpush3.bf16.msra.mxu0 (!%p142_p9), %v1106_v1  ;;  %1061 = vmatpush3.bf16.msra.mxu1 (!%p142_p9), %v1106_v1  ;;  %p1110_p11 = scmp.ne.s32.totalorder (!%p142_p9), %s1497_s25, %s1109_s29 }
  0x14   : > { %988 = vmatprep.subr.bf16.mxu0 (!%p142_p9), %v1107_v2  ;;  %1058 = vmatprep.subr.bf16.mxu1 (!%p142_p9), %v1107_v2 }
  0x15   : > { %s1559_s26 = smov (!%p166_p10, %s903_s26), 127  ;;  %p1111_p12 = pnand %p1110_p11, %p1234_p5 }
  0x16   : > { %s904_s4 = sshll.u32 %s1559_s26, 3 }
  0x17   : > { %s1257_s7 = scalar_lea.vmem %s1548_s0, %s904_s4  ;;  %989 = vmatpush3.bf16.msra.mxu0 %v1107_v2  ;;  %1062 = vmatpush3.bf16.msra.mxu1 %v1107_v2  ;;  %p1112_p13 = pneg %p1111_p12 }
  0x18   : > { %v173_v3 = vld [vmem:[%s1257_s7] sm:$0xff]  ;;  %v174_v4 = vld [vmem:[%s1257_s7 + $0x8] sm:$0xff]  ;;  %v175_v10 = vld [vmem:[%s1257_s7 + $0x10] sm:$0xff]  ;;  %990 = vmatprep.subr.bf16.mxu0 %v1108_v6  ;;  %1059 = vmatprep.subr.bf16.mxu1 %v1108_v6  ;;  %s1113_s4 = sshll.u32 %s1173_s30, 4  ;;  %s1114_s4 = int_to_ptr.vmem [resolvable:$false] %s1113_s4 }
  0x19   : > { %v205_v5 = vld [vmem:[%s1257_s7 + $0x100] sm:$0xff]  ;;  %v237_v7 = vpack.c.bf16 %v174_v4, %v173_v3  ;;  %v206_v8 = vld [vmem:[%s1257_s7 + $0x108] sm:$0xff]  ;;  %v176_v11 = vld [vmem:[%s1257_s7 + $0x18] sm:$0xff]  ;;  %s1115_s5 = scalar_lea.vmem %s1114_s4, 16384  ;;  %p1116_p0 = scmp.lt.s32.totalorder %s1497_s25, %s1114_s4 }
  0x1a   : > { %v253_v9 = vpack.c.bf16 %v206_v8, %v205_v5  ;;  %v207_v12 = vld [vmem:[%s1257_s7 + $0x110] sm:$0xff]  ;;  %v208_v13 = vld [vmem:[%s1257_s7 + $0x118] sm:$0xff]  ;;  %v177_v14 = vld [vmem:[%s1257_s7 + $0x20] sm:$0xff]  ;;  %v238_v18 = vpack.c.bf16 %v176_v11, %v175_v10  ;;  %p1117_p1 = scmp.lt.s32.totalorder %s1115_s5, %s1109_s29 }
  0x1b   : > { %992 = vmatprep.mubr.msk.bf16.mxu0 %vm308_vm0, %v237_v7  ;;  %v178_v15 = vld [vmem:[%s1257_s7 + $0x28] sm:$0xff]  ;;  %v209_v16 = vld [vmem:[%s1257_s7 + $0x120] sm:$0xff]  ;;  %v254_v19 = vpack.c.bf16 %v208_v13, %v207_v12  ;;  %991 = vmatpush3.bf16.msra.mxu0 %v1108_v6  ;;  %v179_v22 = vld [vmem:[%s1257_s7 + $0x30] sm:$0xff] }
  0x1c   : > { %v210_v17 = vld [vmem:[%s1257_s7 + $0x128] sm:$0xff]  ;;  %1024 = vmatprep.mubr.msk.bf16.mxu1 %vm308_vm0, %v253_v9  ;;  %1063 = vmatpush3.bf16.msra.mxu1 %v1108_v6  ;;  %v239_v20 = vpack.c.bf16 %v178_v15, %v177_v14  ;;  %v180_v23 = vld [vmem:[%s1257_s7 + $0x38] sm:$0xff]  ;;  %v211_v24 = vld [vmem:[%s1257_s7 + $0x130] sm:$0xff]  ;;  %p1118_p2 = por %p1117_p1, %p1116_p0 }
  0x1d   : > { %v255_v21 = vpack.c.bf16 %v210_v17, %v209_v16  ;;  %v212_v25 = vld [vmem:[%s1257_s7 + $0x138] sm:$0xff]  ;;  %v181_v26 = vld [vmem:[%s1257_s7 + $0x40] sm:$0xff]  ;;  %v182_v27 = vld [vmem:[%s1257_s7 + $0x48] sm:$0xff]  ;;  %v240_v30 = vpack.c.bf16 %v180_v23, %v179_v22 }
  0x1e   : > { %993 = vmatmul.mubr.msk.bf16.vlgmr.msra.gmra.mrb[0].mxu0 %vm308_vm0, %v238_v18  ;;  %v213_v28 = vld [vmem:[%s1257_s7 + $0x140] sm:$0xff]  ;;  %v214_v29 = vld [vmem:[%s1257_s7 + $0x148] sm:$0xff]  ;;  %v256_v31 = vpack.c.bf16 %v212_v25, %v211_v24  ;;  %v241_v32 = vpack.c.bf16 %v182_v27, %v181_v26  ;;  %v183_v34 = vld [vmem:[%s1257_s7 + $0x50] sm:$0xff]  ;;  %p1119_p3 = pnand %p1118_p2, %p1112_p13 }
  0x1f   : > { %1025 = vmatmul.mubr.msk.bf16.vlgmr.msra.gmra.mrb[0].mxu1 %vm308_vm0, %v254_v19  ;;  %996 = vmatprep.mubr.msk.bf16.mxu0 %vm308_vm0, %v239_v20  ;;  %v257_v33 = vpack.c.bf16 %v214_v29, %v213_v28  ;;  %v184_v35 = vld [vmem:[%s1257_s7 + $0x58] sm:$0xff]  ;;  %v215_v36 = vld [vmem:[%s1257_s7 + $0x150] sm:$0xff]  ;;  %v185_v38 = vld [vmem:[%s1257_s7 + $0x60] sm:$0xff] }
  0x20   : > { %1028 = vmatprep.mubr.msk.bf16.mxu1 %vm308_vm0, %v255_v21  ;;  %v216_v37 = vld [vmem:[%s1257_s7 + $0x158] sm:$0xff]  ;;  %v186_v39 = vld [vmem:[%s1257_s7 + $0x68] sm:$0xff]  ;;  %v217_v40 = vld [vmem:[%s1257_s7 + $0x160] sm:$0xff]  ;;  %v242_v42 = vpack.c.bf16 %v184_v35, %v183_v34 }
  0x21   : > { %v218_v41 = vld [vmem:[%s1257_s7 + $0x168] sm:$0xff]  ;;  %v258_v43 = vpack.c.bf16 %v216_v37, %v215_v36  ;;  %v243_v44 = vpack.c.bf16 %v186_v39, %v185_v38  ;;  %v187_v46 = vld [vmem:[%s1257_s7 + $0x70] sm:$0xff]  ;;  %v188_v47 = vld [vmem:[%s1257_s7 + $0x78] sm:$0xff] }
  0x22   : > { %v259_v45 = vpack.c.bf16 %v218_v41, %v217_v40  ;;  %v219_v48 = vld [vmem:[%s1257_s7 + $0x170] sm:$0xff]  ;;  %v220_v49 = vld [vmem:[%s1257_s7 + $0x178] sm:$0xff]  ;;  %v189_v50 = vld [vmem:[%s1257_s7 + $0x80] sm:$0xff]  ;;  %v244_v54 = vpack.c.bf16 %v188_v47, %v187_v46 }
  0x23   : > { %v190_v51 = vld [vmem:[%s1257_s7 + $0x88] sm:$0xff]  ;;  %v221_v52 = vld [vmem:[%s1257_s7 + $0x180] sm:$0xff]  ;;  %v260_v55 = vpack.c.bf16 %v220_v49, %v219_v48  ;;  %v191_v58 = vld [vmem:[%s1257_s7 + $0x90] sm:$0xff] }
  0x24   : > { %v222_v53 = vld [vmem:[%s1257_s7 + $0x188] sm:$0xff]  ;;  %v245_v56 = vpack.c.bf16 %v190_v51, %v189_v50  ;;  %v192_v59 = vld [vmem:[%s1257_s7 + $0x98] sm:$0xff]  ;;  %v223_v60 = vld [vmem:[%s1257_s7 + $0x190] sm:$0xff] }
  0x25   : > { %v261_v57 = vpack.c.bf16 %v222_v53, %v221_v52  ;;  %v224_v61 = vld [vmem:[%s1257_s7 + $0x198] sm:$0xff]  ;;  %v193_v62 = vld [vmem:[%s1257_s7 + $0xa0] sm:$0xff]  ;;  %v194_v63 = vld [vmem:[%s1257_s7 + $0xa8] sm:$0xff]  ;;  %v246_v2 = vpack.c.bf16 %v192_v59, %v191_v58 }
  0x26   : > { %997 = vmatmul.mubr.msk.bf16.gmra.mrb[4].mxu0 %vm308_vm0, %v240_v30  ;;  %v225_v0 = vld [vmem:[%s1257_s7 + $0x1a0] sm:$0xff]  ;;  %v226_v1 = vld [vmem:[%s1257_s7 + $0x1a8] sm:$0xff]  ;;  %v262_v3 = vpack.c.bf16 %v224_v61, %v223_v60  ;;  %v247_v4 = vpack.c.bf16 %v194_v63, %v193_v62  ;;  %v195_v6 = vld [vmem:[%s1257_s7 + $0xb0] sm:$0xff] }
  0x27   : > { %1029 = vmatmul.mubr.msk.bf16.gmra.mrb[4].mxu1 %vm308_vm0, %v256_v31  ;;  %1000 = vmatprep.mubr.msk.bf16.mxu0 %vm308_vm0, %v241_v32  ;;  %v263_v5 = vpack.c.bf16 %v226_v1, %v225_v0  ;;  %v196_v7 = vld [vmem:[%s1257_s7 + $0xb8] sm:$0xff]  ;;  %v227_v8 = vld [vmem:[%s1257_s7 + $0x1b0] sm:$0xff]  ;;  %v197_v10 = vld [vmem:[%s1257_s7 + $0xc0] sm:$0xff] }
  0x28   : > { %1032 = vmatprep.mubr.msk.bf16.mxu1 %vm308_vm0, %v257_v33  ;;  %v228_v9 = vld [vmem:[%s1257_s7 + $0x1b8] sm:$0xff]  ;;  %v198_v11 = vld [vmem:[%s1257_s7 + $0xc8] sm:$0xff]  ;;  %v229_v12 = vld [vmem:[%s1257_s7 + $0x1c0] sm:$0xff]  ;;  %v248_v14 = vpack.c.bf16 %v196_v7, %v195_v6 }
  0x29   : > { %v230_v13 = vld [vmem:[%s1257_s7 + $0x1c8] sm:$0xff]  ;;  %v264_v15 = vpack.c.bf16 %v228_v9, %v227_v8  ;;  %v249_v16 = vpack.c.bf16 %v198_v11, %v197_v10  ;;  %v199_v18 = vld [vmem:[%s1257_s7 + $0xd0] sm:$0xff]  ;;  %v200_v19 = vld [vmem:[%s1257_s7 + $0xd8] sm:$0xff] }
  0x2a   : > { %v265_v17 = vpack.c.bf16 %v230_v13, %v229_v12  ;;  %v231_v20 = vld [vmem:[%s1257_s7 + $0x1d0] sm:$0xff]  ;;  %v232_v21 = vld [vmem:[%s1257_s7 + $0x1d8] sm:$0xff]  ;;  %v201_v22 = vld [vmem:[%s1257_s7 + $0xe0] sm:$0xff]  ;;  %v250_v26 = vpack.c.bf16 %v200_v19, %v199_v18 }
  0x2b   : > { %v202_v23 = vld [vmem:[%s1257_s7 + $0xe8] sm:$0xff]  ;;  %v233_v24 = vld [vmem:[%s1257_s7 + $0x1e0] sm:$0xff]  ;;  %v266_v27 = vpack.c.bf16 %v232_v21, %v231_v20  ;;  %v203_v30 = vld [vmem:[%s1257_s7 + $0xf0] sm:$0xff] }
  0x2c   : > { %v234_v25 = vld [vmem:[%s1257_s7 + $0x1e8] sm:$0xff]  ;;  %v251_v28 = vpack.c.bf16 %v202_v23, %v201_v22  ;;  %v204_v31 = vld [vmem:[%s1257_s7 + $0xf8] sm:$0xff]  ;;  %v235_v32 = vld [vmem:[%s1257_s7 + $0x1f0] sm:$0xff] }
  0x2d   : > { %v267_v29 = vpack.c.bf16 %v234_v25, %v233_v24  ;;  %v236_v33 = vld [vmem:[%s1257_s7 + $0x1f8] sm:$0xff]  ;;  %v252_v34 = vpack.c.bf16 %v204_v31, %v203_v30  ;;  %v1362_v36 = vld [vmem:[%s1550_s2] ss:$0 sm:$0xff] }
  0x2e   : > { %1001 = vmatmul.mubr.msk.bf16.gmra.mrb[8].mxu0 %vm308_vm0, %v242_v42  ;;  %v268_v35 = vpack.c.bf16 %v236_v33, %v235_v32 }
  0x2f   : > { %1033 = vmatmul.mubr.msk.bf16.gmra.mrb[8].mxu1 %vm308_vm0, %v258_v43  ;;  %1004 = vmatprep.mubr.msk.bf16.mxu0 %vm308_vm0, %v243_v44 }
  0x30   : > { %1036 = vmatprep.mubr.msk.bf16.mxu1 %vm308_vm0, %v259_v45 }
  0x36   : > { %1005 = vmatmul.mubr.msk.bf16.gmra.mrb[12].mxu0 %vm308_vm0, %v244_v54 }
  0x37   : > { %1037 = vmatmul.mubr.msk.bf16.gmra.mrb[12].mxu1 %vm308_vm0, %v260_v55  ;;  %1008 = vmatprep.mubr.msk.bf16.mxu0 %vm308_vm0, %v245_v56 }
  0x38   : > { %1040 = vmatprep.mubr.msk.bf16.mxu1 %vm308_vm0, %v261_v57 }
  0x3e   : > { %1009 = vmatmul.mubr.msk.bf16.gmra.mrb[16].mxu0 %vm308_vm0, %v246_v2 }
  0x3f   : > { %1041 = vmatmul.mubr.msk.bf16.gmra.mrb[16].mxu1 %vm308_vm0, %v262_v3  ;;  %1012 = vmatprep.mubr.msk.bf16.mxu0 %vm308_vm0, %v247_v4 }
  0x40   : > { %1044 = vmatprep.mubr.msk.bf16.mxu1 %vm308_vm0, %v263_v5 }
  0x46   : > { %1013 = vmatmul.mubr.msk.bf16.gmra.mrb[20].mxu0 %vm308_vm0, %v248_v14 }
  0x47   : > { %1045 = vmatmul.mubr.msk.bf16.gmra.mrb[20].mxu1 %vm308_vm0, %v264_v15  ;;  %1016 = vmatprep.mubr.msk.bf16.mxu0 %vm308_vm0, %v249_v16 }
  0x48   : > { %1048 = vmatprep.mubr.msk.bf16.mxu1 %vm308_vm0, %v265_v17 }
  0x4e   : > { %1017 = vmatmul.mubr.msk.bf16.gmra.mrb[24].mxu0 %vm308_vm0, %v250_v26 }
  0x4f   : > { %1049 = vmatmul.mubr.msk.bf16.gmra.mrb[24].mxu1 %vm308_vm0, %v266_v27  ;;  %1020 = vmatprep.mubr.msk.bf16.mxu0 %vm308_vm0, %v251_v28 }
  0x50   : > { %1052 = vmatprep.mubr.msk.bf16.mxu1 %vm308_vm0, %v267_v29 }
  0x56   : > { %1021 = vmatmul.mubr.msk.bf16.gmra.mrb[28].mxu0 %vm308_vm0, %v252_v34 }
  0x57   : > { %1053 = vmatmul.mubr.msk.bf16.gmra.mrb[28].mxu1 %vm308_vm0, %v268_v35 }
  0xf1   : > { %v994_v37 = vpop.f32.mrb[0].mxu0 }
  0xf2   : > { %v1026_v38 = vpop.f32.mrb[0].mxu1  ;;  %v448_v39 = vadd.f32 %v994_v37, %v1362_v36  ;;  %v439_v41 = vpop.f32.mrb[1].mxu0 }
  0xf3   : > { %v576_v40 = vadd.f32 %v1026_v38, %v1362_v36  ;;  %v567_v42 = vpop.f32.mrb[1].mxu1  ;;  %v440_v43 = vadd.f32 %v1362_v36, %v439_v41  ;;  %v995_v45 = vpop.f32.mrb[2].mxu0 }
  0xf4   : > { %v568_v44 = vadd.f32 %v1362_v36, %v567_v42  ;;  %v1027_v46 = vpop.f32.mrb[2].mxu1  ;;  %v696_v47 = vmax.f32 %v448_v39, 0.0  ;;  %v451_v49 = vadd.f32 %v995_v45, %v1362_v36  ;;  %v442_v51 = vpop.f32.mrb[3].mxu0 }
  0xf5   : > { %v728_v48 = vmax.f32 %v576_v40, 0.0  ;;  %v579_v50 = vadd.f32 %v1027_v46, %v1362_v36  ;;  %v570_v52 = vpop.f32.mrb[3].mxu1  ;;  %v694_v53 = vmax.f32 %v440_v43, 0.0  ;;  %v443_v55 = vadd.f32 %v1362_v36, %v442_v51 }
  0xf6   : > { %v726_v54 = vmax.f32 %v568_v44, 0.0  ;;  %v571_v56 = vadd.f32 %v1362_v36, %v570_v52  ;;  %760 = vst [vmem:[%s1374_s20 + $0x10] sm:$0xff] %v696_v47  ;;  %v697_v57 = vmax.f32 %v451_v49, 0.0 }
  0xf7   : > { %792 = vst [vmem:[%s1374_s20 + $0x110] sm:$0xff] %v728_v48  ;;  %v729_v58 = vmax.f32 %v579_v50, 0.0  ;;  %758 = vst [vmem:[%s1374_s20] sm:$0xff] %v694_v53  ;;  %v695_v59 = vmax.f32 %v443_v55, 0.0 }
  0xf8   : > { %790 = vst [vmem:[%s1374_s20 + $0x100] sm:$0xff] %v726_v54  ;;  %v727_v60 = vmax.f32 %v571_v56, 0.0  ;;  %761 = vst [vmem:[%s1374_s20 + $0x18] sm:$0xff] %v697_v57 }
  0xf9   : > { %793 = vst [vmem:[%s1374_s20 + $0x118] sm:$0xff] %v729_v58  ;;  %759 = vst [vmem:[%s1374_s20 + $0x8] sm:$0xff] %v695_v59  ;;  %v998_v61 = vpop.f32.mrb[4].mxu0 }
  0xfa   : > { %791 = vst [vmem:[%s1374_s20 + $0x108] sm:$0xff] %v727_v60  ;;  %v1030_v62 = vpop.f32.mrb[4].mxu1  ;;  %v464_v63 = vadd.f32 %v998_v61, %v1362_v36  ;;  %v455_v1 = vpop.f32.mrb[5].mxu0 }
  0xfb   : > { %v592_v0 = vadd.f32 %v1030_v62, %v1362_v36  ;;  %v583_v2 = vpop.f32.mrb[5].mxu1  ;;  %v456_v3 = vadd.f32 %v1362_v36, %v455_v1  ;;  %v999_v5 = vpop.f32.mrb[6].mxu0 }
  0xfc   : > { %v584_v4 = vadd.f32 %v1362_v36, %v583_v2  ;;  %v1031_v6 = vpop.f32.mrb[6].mxu1  ;;  %v700_v7 = vmax.f32 %v464_v63, 0.0  ;;  %v467_v9 = vadd.f32 %v999_v5, %v1362_v36  ;;  %v458_v11 = vpop.f32.mrb[7].mxu0 }
  0xfd   : > { %v732_v8 = vmax.f32 %v592_v0, 0.0  ;;  %v595_v10 = vadd.f32 %v1031_v6, %v1362_v36  ;;  %v586_v12 = vpop.f32.mrb[7].mxu1  ;;  %v698_v13 = vmax.f32 %v456_v3, 0.0  ;;  %v459_v15 = vadd.f32 %v1362_v36, %v458_v11 }
  0xfe   : > { %v730_v14 = vmax.f32 %v584_v4, 0.0  ;;  %v587_v16 = vadd.f32 %v1362_v36, %v586_v12  ;;  %764 = vst [vmem:[%s1374_s20 + $0x30] sm:$0xff] %v700_v7  ;;  %v701_v17 = vmax.f32 %v467_v9, 0.0 }
  0xff   : > { %796 = vst [vmem:[%s1374_s20 + $0x130] sm:$0xff] %v732_v8  ;;  %v733_v18 = vmax.f32 %v595_v10, 0.0  ;;  %762 = vst [vmem:[%s1374_s20 + $0x20] sm:$0xff] %v698_v13  ;;  %v699_v19 = vmax.f32 %v459_v15, 0.0 }
 0x100   : > { %794 = vst [vmem:[%s1374_s20 + $0x120] sm:$0xff] %v730_v14  ;;  %v731_v20 = vmax.f32 %v587_v16, 0.0  ;;  %765 = vst [vmem:[%s1374_s20 + $0x38] sm:$0xff] %v701_v17 }
 0x101   : > { %797 = vst [vmem:[%s1374_s20 + $0x138] sm:$0xff] %v733_v18  ;;  %763 = vst [vmem:[%s1374_s20 + $0x28] sm:$0xff] %v699_v19  ;;  %v1002_v21 = vpop.f32.mrb[8].mxu0 }
 0x102   : > { %795 = vst [vmem:[%s1374_s20 + $0x128] sm:$0xff] %v731_v20  ;;  %v1034_v22 = vpop.f32.mrb[8].mxu1  ;;  %v480_v23 = vadd.f32 %v1002_v21, %v1362_v36  ;;  %v471_v25 = vpop.f32.mrb[9].mxu0 }
 0x103   : > { %v608_v24 = vadd.f32 %v1034_v22, %v1362_v36  ;;  %v599_v26 = vpop.f32.mrb[9].mxu1  ;;  %v472_v27 = vadd.f32 %v1362_v36, %v471_v25  ;;  %v1003_v29 = vpop.f32.mrb[10].mxu0 }
 0x104   : > { %v600_v28 = vadd.f32 %v1362_v36, %v599_v26  ;;  %v1035_v30 = vpop.f32.mrb[10].mxu1  ;;  %v704_v31 = vmax.f32 %v480_v23, 0.0  ;;  %v483_v33 = vadd.f32 %v1003_v29, %v1362_v36  ;;  %v474_v35 = vpop.f32.mrb[11].mxu0 }
 0x105   : > { %v736_v32 = vmax.f32 %v608_v24, 0.0  ;;  %v611_v34 = vadd.f32 %v1035_v30, %v1362_v36  ;;  %v602_v37 = vpop.f32.mrb[11].mxu1  ;;  %v702_v38 = vmax.f32 %v472_v27, 0.0  ;;  %v475_v40 = vadd.f32 %v1362_v36, %v474_v35 }
 0x106   : > { %v734_v39 = vmax.f32 %v600_v28, 0.0  ;;  %v603_v41 = vadd.f32 %v1362_v36, %v602_v37  ;;  %768 = vst [vmem:[%s1374_s20 + $0x50] sm:$0xff] %v704_v31  ;;  %v705_v42 = vmax.f32 %v483_v33, 0.0 }
 0x107   : > { %800 = vst [vmem:[%s1374_s20 + $0x150] sm:$0xff] %v736_v32  ;;  %v737_v43 = vmax.f32 %v611_v34, 0.0  ;;  %766 = vst [vmem:[%s1374_s20 + $0x40] sm:$0xff] %v702_v38  ;;  %v703_v44 = vmax.f32 %v475_v40, 0.0 }
 0x108   : > { %798 = vst [vmem:[%s1374_s20 + $0x140] sm:$0xff] %v734_v39  ;;  %v735_v45 = vmax.f32 %v603_v41, 0.0  ;;  %769 = vst [vmem:[%s1374_s20 + $0x58] sm:$0xff] %v705_v42 }
 0x109   : > { %801 = vst [vmem:[%s1374_s20 + $0x158] sm:$0xff] %v737_v43  ;;  %767 = vst [vmem:[%s1374_s20 + $0x48] sm:$0xff] %v703_v44  ;;  %v1006_v46 = vpop.f32.mrb[12].mxu0 }
 0x10a   : > { %799 = vst [vmem:[%s1374_s20 + $0x148] sm:$0xff] %v735_v45  ;;  %v1038_v47 = vpop.f32.mrb[12].mxu1  ;;  %v496_v48 = vadd.f32 %v1006_v46, %v1362_v36  ;;  %v487_v50 = vpop.f32.mrb[13].mxu0 }
 0x10b   : > { %v624_v49 = vadd.f32 %v1038_v47, %v1362_v36  ;;  %v615_v51 = vpop.f32.mrb[13].mxu1  ;;  %v488_v52 = vadd.f32 %v1362_v36, %v487_v50  ;;  %v1007_v54 = vpop.f32.mrb[14].mxu0 }
 0x10c   : > { %v616_v53 = vadd.f32 %v1362_v36, %v615_v51  ;;  %v1039_v55 = vpop.f32.mrb[14].mxu1  ;;  %v708_v56 = vmax.f32 %v496_v48, 0.0  ;;  %v499_v58 = vadd.f32 %v1007_v54, %v1362_v36  ;;  %v490_v60 = vpop.f32.mrb[15].mxu0 }
 0x10d   : > { %v740_v57 = vmax.f32 %v624_v49, 0.0  ;;  %v627_v59 = vadd.f32 %v1039_v55, %v1362_v36  ;;  %v618_v61 = vpop.f32.mrb[15].mxu1  ;;  %v706_v62 = vmax.f32 %v488_v52, 0.0  ;;  %v491_v0 = vadd.f32 %v1362_v36, %v490_v60 }
 0x10e   : > { %v738_v63 = vmax.f32 %v616_v53, 0.0  ;;  %v619_v1 = vadd.f32 %v1362_v36, %v618_v61  ;;  %772 = vst [vmem:[%s1374_s20 + $0x70] sm:$0xff] %v708_v56  ;;  %v709_v2 = vmax.f32 %v499_v58, 0.0 }
 0x10f   : > { %804 = vst [vmem:[%s1374_s20 + $0x170] sm:$0xff] %v740_v57  ;;  %v741_v3 = vmax.f32 %v627_v59, 0.0  ;;  %770 = vst [vmem:[%s1374_s20 + $0x60] sm:$0xff] %v706_v62  ;;  %v707_v4 = vmax.f32 %v491_v0, 0.0 }
 0x110   : > { %802 = vst [vmem:[%s1374_s20 + $0x160] sm:$0xff] %v738_v63  ;;  %v739_v5 = vmax.f32 %v619_v1, 0.0  ;;  %773 = vst [vmem:[%s1374_s20 + $0x78] sm:$0xff] %v709_v2 }
 0x111   : > { %805 = vst [vmem:[%s1374_s20 + $0x178] sm:$0xff] %v741_v3  ;;  %771 = vst [vmem:[%s1374_s20 + $0x68] sm:$0xff] %v707_v4  ;;  %v1010_v6 = vpop.f32.mrb[16].mxu0 }
 0x112   : > { %803 = vst [vmem:[%s1374_s20 + $0x168] sm:$0xff] %v739_v5  ;;  %v1042_v7 = vpop.f32.mrb[16].mxu1  ;;  %v512_v8 = vadd.f32 %v1010_v6, %v1362_v36  ;;  %v503_v10 = vpop.f32.mrb[17].mxu0 }
 0x113   : > { %v640_v9 = vadd.f32 %v1042_v7, %v1362_v36  ;;  %v631_v11 = vpop.f32.mrb[17].mxu1  ;;  %v504_v12 = vadd.f32 %v1362_v36, %v503_v10  ;;  %v1011_v14 = vpop.f32.mrb[18].mxu0 }
 0x114   : > { %v632_v13 = vadd.f32 %v1362_v36, %v631_v11  ;;  %v1043_v15 = vpop.f32.mrb[18].mxu1  ;;  %v712_v16 = vmax.f32 %v512_v8, 0.0  ;;  %v515_v18 = vadd.f32 %v1011_v14, %v1362_v36  ;;  %v506_v20 = vpop.f32.mrb[19].mxu0 }
 0x115   : > { %v744_v17 = vmax.f32 %v640_v9, 0.0  ;;  %v643_v19 = vadd.f32 %v1043_v15, %v1362_v36  ;;  %v634_v21 = vpop.f32.mrb[19].mxu1  ;;  %v710_v22 = vmax.f32 %v504_v12, 0.0  ;;  %v507_v24 = vadd.f32 %v1362_v36, %v506_v20 }
 0x116   : > { %v742_v23 = vmax.f32 %v632_v13, 0.0  ;;  %v635_v25 = vadd.f32 %v1362_v36, %v634_v21  ;;  %776 = vst [vmem:[%s1374_s20 + $0x90] sm:$0xff] %v712_v16  ;;  %v713_v26 = vmax.f32 %v515_v18, 0.0 }
 0x117   : > { %808 = vst [vmem:[%s1374_s20 + $0x190] sm:$0xff] %v744_v17  ;;  %v745_v27 = vmax.f32 %v643_v19, 0.0  ;;  %774 = vst [vmem:[%s1374_s20 + $0x80] sm:$0xff] %v710_v22  ;;  %v711_v28 = vmax.f32 %v507_v24, 0.0 }
 0x118   : > { %806 = vst [vmem:[%s1374_s20 + $0x180] sm:$0xff] %v742_v23  ;;  %v743_v29 = vmax.f32 %v635_v25, 0.0  ;;  %777 = vst [vmem:[%s1374_s20 + $0x98] sm:$0xff] %v713_v26 }
 0x119   : > { %809 = vst [vmem:[%s1374_s20 + $0x198] sm:$0xff] %v745_v27  ;;  %775 = vst [vmem:[%s1374_s20 + $0x88] sm:$0xff] %v711_v28  ;;  %v1014_v30 = vpop.f32.mrb[20].mxu0 }
 0x11a   : > { %807 = vst [vmem:[%s1374_s20 + $0x188] sm:$0xff] %v743_v29  ;;  %v1046_v31 = vpop.f32.mrb[20].mxu1  ;;  %v528_v32 = vadd.f32 %v1014_v30, %v1362_v36  ;;  %v519_v34 = vpop.f32.mrb[21].mxu0 }
 0x11b   : > { %v656_v33 = vadd.f32 %v1046_v31, %v1362_v36  ;;  %v647_v35 = vpop.f32.mrb[21].mxu1  ;;  %v520_v37 = vadd.f32 %v1362_v36, %v519_v34  ;;  %v1015_v39 = vpop.f32.mrb[22].mxu0 }
 0x11c   : > { %v648_v38 = vadd.f32 %v1362_v36, %v647_v35  ;;  %v1047_v40 = vpop.f32.mrb[22].mxu1  ;;  %v716_v41 = vmax.f32 %v528_v32, 0.0  ;;  %v531_v43 = vadd.f32 %v1015_v39, %v1362_v36  ;;  %v522_v45 = vpop.f32.mrb[23].mxu0 }
 0x11d   : > { %v748_v42 = vmax.f32 %v656_v33, 0.0  ;;  %v659_v44 = vadd.f32 %v1047_v40, %v1362_v36  ;;  %v650_v46 = vpop.f32.mrb[23].mxu1  ;;  %v714_v47 = vmax.f32 %v520_v37, 0.0  ;;  %v523_v49 = vadd.f32 %v1362_v36, %v522_v45 }
 0x11e   : > { %v746_v48 = vmax.f32 %v648_v38, 0.0  ;;  %v651_v50 = vadd.f32 %v1362_v36, %v650_v46  ;;  %780 = vst [vmem:[%s1374_s20 + $0xb0] sm:$0xff] %v716_v41  ;;  %v717_v51 = vmax.f32 %v531_v43, 0.0 }
 0x11f   : > { %812 = vst [vmem:[%s1374_s20 + $0x1b0] sm:$0xff] %v748_v42  ;;  %v749_v52 = vmax.f32 %v659_v44, 0.0  ;;  %778 = vst [vmem:[%s1374_s20 + $0xa0] sm:$0xff] %v714_v47  ;;  %v715_v53 = vmax.f32 %v523_v49, 0.0 }
 0x120   : > { %810 = vst [vmem:[%s1374_s20 + $0x1a0] sm:$0xff] %v746_v48  ;;  %v747_v54 = vmax.f32 %v651_v50, 0.0  ;;  %781 = vst [vmem:[%s1374_s20 + $0xb8] sm:$0xff] %v717_v51 }
 0x121   : > { %813 = vst [vmem:[%s1374_s20 + $0x1b8] sm:$0xff] %v749_v52  ;;  %779 = vst [vmem:[%s1374_s20 + $0xa8] sm:$0xff] %v715_v53  ;;  %v1018_v55 = vpop.f32.mrb[24].mxu0 }
 0x122   : > { %811 = vst [vmem:[%s1374_s20 + $0x1a8] sm:$0xff] %v747_v54  ;;  %v1050_v56 = vpop.f32.mrb[24].mxu1  ;;  %v544_v57 = vadd.f32 %v1018_v55, %v1362_v36  ;;  %v535_v59 = vpop.f32.mrb[25].mxu0 }
 0x123   : > { %v672_v58 = vadd.f32 %v1050_v56, %v1362_v36  ;;  %v663_v60 = vpop.f32.mrb[25].mxu1  ;;  %v536_v61 = vadd.f32 %v1362_v36, %v535_v59  ;;  %v1019_v63 = vpop.f32.mrb[26].mxu0 }
 0x124   : > { %v664_v62 = vadd.f32 %v1362_v36, %v663_v60  ;;  %v1051_v0 = vpop.f32.mrb[26].mxu1  ;;  %v720_v1 = vmax.f32 %v544_v57, 0.0  ;;  %v547_v3 = vadd.f32 %v1019_v63, %v1362_v36  ;;  %v538_v5 = vpop.f32.mrb[27].mxu0 }
 0x125   : > { %v752_v2 = vmax.f32 %v672_v58, 0.0  ;;  %v675_v4 = vadd.f32 %v1051_v0, %v1362_v36  ;;  %v666_v6 = vpop.f32.mrb[27].mxu1  ;;  %v718_v7 = vmax.f32 %v536_v61, 0.0  ;;  %v539_v9 = vadd.f32 %v1362_v36, %v538_v5 }
 0x126   : > { %v750_v8 = vmax.f32 %v664_v62, 0.0  ;;  %v667_v10 = vadd.f32 %v1362_v36, %v666_v6  ;;  %784 = vst [vmem:[%s1374_s20 + $0xd0] sm:$0xff] %v720_v1  ;;  %v721_v11 = vmax.f32 %v547_v3, 0.0 }
 0x127   : > { %816 = vst [vmem:[%s1374_s20 + $0x1d0] sm:$0xff] %v752_v2  ;;  %v753_v12 = vmax.f32 %v675_v4, 0.0  ;;  %782 = vst [vmem:[%s1374_s20 + $0xc0] sm:$0xff] %v718_v7  ;;  %v719_v13 = vmax.f32 %v539_v9, 0.0 }
 0x128   : > { %814 = vst [vmem:[%s1374_s20 + $0x1c0] sm:$0xff] %v750_v8  ;;  %v751_v14 = vmax.f32 %v667_v10, 0.0  ;;  %785 = vst [vmem:[%s1374_s20 + $0xd8] sm:$0xff] %v721_v11 }
 0x129   : > { %817 = vst [vmem:[%s1374_s20 + $0x1d8] sm:$0xff] %v753_v12  ;;  %783 = vst [vmem:[%s1374_s20 + $0xc8] sm:$0xff] %v719_v13  ;;  %v1022_v15 = vpop.f32.mrb[28].mxu0 }
 0x12a   : > { %815 = vst [vmem:[%s1374_s20 + $0x1c8] sm:$0xff] %v751_v14  ;;  %v1054_v16 = vpop.f32.mrb[28].mxu1  ;;  %v560_v17 = vadd.f32 %v1022_v15, %v1362_v36  ;;  %v551_v19 = vpop.f32.mrb[29].mxu0 }
 0x12b   : > { %v688_v18 = vadd.f32 %v1054_v16, %v1362_v36  ;;  %v679_v20 = vpop.f32.mrb[29].mxu1  ;;  %v552_v21 = vadd.f32 %v1362_v36, %v551_v19  ;;  %v1023_v23 = vpop.f32.mrb[30].mxu0 }
 0x12c   : > { %v680_v22 = vadd.f32 %v1362_v36, %v679_v20  ;;  %v1055_v24 = vpop.f32.mrb[30].mxu1  ;;  %v724_v25 = vmax.f32 %v560_v17, 0.0  ;;  %v563_v27 = vadd.f32 %v1023_v23, %v1362_v36  ;;  %v554_v29 = vpop.f32.mrb[31].mxu0 }
 0x12d   : > { %v756_v26 = vmax.f32 %v688_v18, 0.0  ;;  %v691_v28 = vadd.f32 %v1055_v24, %v1362_v36  ;;  %v682_v30 = vpop.f32.mrb[31].mxu1  ;;  %v722_v31 = vmax.f32 %v552_v21, 0.0  ;;  %v555_v33 = vadd.f32 %v1362_v36, %v554_v29 }
 0x12e   : > { %v754_v32 = vmax.f32 %v680_v22, 0.0  ;;  %v683_v34 = vadd.f32 %v1362_v36, %v682_v30  ;;  %788 = vst [vmem:[%s1374_s20 + $0xf0] sm:$0xff] %v724_v25  ;;  %v725_v35 = vmax.f32 %v563_v27, 0.0 }
 0x12f   : > { %820 = vst [vmem:[%s1374_s20 + $0x1f0] sm:$0xff] %v756_v26  ;;  %v757_v37 = vmax.f32 %v691_v28, 0.0  ;;  %786 = vst [vmem:[%s1374_s20 + $0xe0] sm:$0xff] %v722_v31  ;;  %v723_v38 = vmax.f32 %v555_v33, 0.0 }
 0x130   : > { %818 = vst [vmem:[%s1374_s20 + $0x1e0] sm:$0xff] %v754_v32  ;;  %v755_v39 = vmax.f32 %v683_v34, 0.0  ;;  %789 = vst [vmem:[%s1374_s20 + $0xf8] sm:$0xff] %v725_v35 }
 0x131   : > { %821 = vst [vmem:[%s1374_s20 + $0x1f8] sm:$0xff] %v757_v37  ;;  %787 = vst [vmem:[%s1374_s20 + $0xe8] sm:$0xff] %v723_v38 }
 0x132   : > { %819 = vst [vmem:[%s1374_s20 + $0x1e8] sm:$0xff] %v755_v39 }
 0x133   : > { %1122 = shalt.err (!%p1119_p3)
}
 0x134   : > { %s1123_s6 = scalar_lea.hbm %s1495_s27, 8192  ;;  %s1127_s9 = scalar_lea.hbm %s1551_s3, 16384 }
 0x135   : > { %p1124_p4 = scmp.ne.s32.totalorder %s1495_s27, %s1123_s6  ;;  %p1128_p9 = scmp.lt.u32.totalorder %s1495_s27, %s1551_s3 }
 0x136   : > { %p1129_p10 = scmp.lt.u32.totalorder %s1127_s9, %s1123_s6  ;;  %p1131_p12 = scmp.lt.u32.totalorder %s1123_s6, %s1495_s27 }
 0x137   : > { %p1125_p7 = pnand %p1124_p4, %p1234_p5 }
 0x138   : > { %p1130_p11 = por %p1129_p10, %p1128_p9 }
 0x139   : > { %p1126_p8 = pneg %p1125_p7 }
 0x13a   : > { %p1132_p13 = por %p1131_p12, %p1130_p11 }
 0x13c   : > { %p1133_p0 = pnand %p1132_p13, %p1126_p8 }
 0x13e   : > { %1136 = shalt.err (!%p1133_p0)
}
 0x13f   : > { %s1174_s17 = smov 128   ;;  %s1175_s19 = smov 8  }
 0x140   : > { %1064 = dma.vmem_to_hbm [thread:$0]  (%p1234_p5), %s1497_s25, 8192, %s1495_s27, %s1507_s28, %s1174_s17, %s1174_s17, %s1175_s19  }
 0x141 PF: > { %p1070_p1 = scmp.ge.s32.totalorder %s1171_s15, 2  ;;  %s851_s20 = sand.u32 1, %s1159_s12  }
 0x142   : > { %s852_s24 = scalar_lea.sflag [#allocation3], %s851_s20 }
 0x143   : > { %p1067_p2 = pnand %p1070_p1, %p1238_p6 }
 0x145   : > { %1154 = dma.done.wait (!%p1067_p2), %s852_s24, 8192  }
 0x146   : > { %1156 = vsyncadd (!%p1067_p2), %s852_s24, 4294959104  ;;  %p13_p3 = scmp.ge.s32.totalorder %s1221_s18, 4   ;;  %s1554_s12 = smov %s1163_s13 }
 0x147   : > { %s1555_s13 = smov %s1167_s14  ;;  %s1556_s14 = smov %s1232_s21 }
 0x148   : > { %s1557_s15 = smov %s1221_s18  ;;  %15 = sbr.rel (!%p13_p3) target bundleno = 3 (0x3), region = 67 }
 0x14f   :  { %857 = vsyncpa [#allocation3], 1 }
 0x150   :  { %859 = vsyncpa [#allocation3 + $0x1], 1 }

</bundles_post_ra>
